<compile_context>
chip_gen: v6e
topology: v6e:2x2x1
jax: 0.10.0
libtpu: 0.0.40
codegen_flags: <defaults>
</compile_context>

<pallas_src>
import jax
import jax.numpy as jnp
from jax.experimental import pallas as pl
from jax.experimental.pallas import tpu as pltpu

_LANE = 128
_SUBLANE = 8


def _neg_bce_with_logits(x, y):
    # Numerically stable: -( max(x,0) - x*y + log1p(exp(-|x|)) )
    return -(jnp.maximum(x, 0.0) - x * y + jnp.log1p(jnp.exp(-jnp.abs(x))))


def _bernoulli_logprob_kernel(logits_ref, target_ref, out_ref):
    # Upcast to f32 for the transcendental math (required on v5e; keeps PyTorch bit-parity elsewhere).
    x = logits_ref[...].astype(jnp.float32)
    y = target_ref[...].astype(jnp.float32)
    out_ref[...] = _neg_bce_with_logits(x, y).astype(out_ref.dtype)


def _tpu_layout():
    """Return (block_row_cap, tensorcores_per_chip) for the local TPU generation."""
    try:
        kind = jax.devices()[0].device_kind.lower()
    except Exception:
        kind = ""
    if "v7" in kind:
        # ~3.2 TB/s per-TC HBM: use 4 MiB/array blocks (24 MiB double-buffered, under 32 MiB scoped)
        # and split across the 2 TensorCores.
        return 8192, 2
    if "lite" in kind or "v5e" in kind or "v6e" in kind:
        # Single-TensorCore chips: 2 MiB/array blocks (12 MiB double-buffered), no forced split.
        return 4096, 1
    # v4 / v5p megacore or unknown: assume 2 cores (harmless if 1), conservative block cap.
    return 4096, 2


def _round_up(x, m):
    return (x + m - 1) // m * m


def _choose_block_rows(rows, cap, num_cores):
    """Block height: as large as possible (<= cap), even grid split on multi-core chips."""
    if rows <= _SUBLANE:
        return rows  # full-array block (allowed even when rows < 8)
    if num_cores <= 1:
        # Single TensorCore: one big block if it fits; otherwise stream cap-sized blocks.
        return rows if rows <= cap else cap
    # Multi-TensorCore: even grid length (>= 2) so the "parallel" axis splits cleanly across cores.
    grid = 2
    blk = _round_up(pl.cdiv(rows, grid), _SUBLANE)
    while blk > cap:
        grid += 2
        blk = _round_up(pl.cdiv(rows, grid), _SUBLANE)
    return blk


def _run_kernel(x2, y2, out_dtype, blk):
    rows = x2.shape[0]
    grid = (pl.cdiv(rows, blk),)
    return pl.pallas_call(
        _bernoulli_logprob_kernel,
        out_shape=jax.ShapeDtypeStruct((rows, _LANE), out_dtype),
        grid_spec=pltpu.PrefetchScalarGridSpec(
            num_scalar_prefetch=0,
            grid=grid,
            in_specs=[
                pl.BlockSpec((blk, _LANE), lambda i: (i, 0)),
                pl.BlockSpec((blk, _LANE), lambda i: (i, 0)),
            ],
            out_specs=pl.BlockSpec((blk, _LANE), lambda i: (i, 0)),
        ),
        compiler_params=pltpu.CompilerParams(
            dimension_semantics=("parallel",),
            # No-op on v6e/v7x (32 MiB default); raises v5e's 16 MiB scoped default so large
            # double-buffered blocks never throttle.
            vmem_limit_bytes=32 * 1024 * 1024,
        ),
    )(x2, y2)


def bernoulli_log_prob(logits, target):
    """Elementwise -BCEWithLogitsLoss(reduction='none')(logits, target)."""
    assert logits.shape == target.shape, "logits/target must have the same shape"
    orig_shape = logits.shape
    out_dtype = jnp.result_type(logits.dtype, target.dtype)
    total = logits.size
    if total == 0:
        return jnp.zeros(orig_shape, out_dtype)

    cap, cores = _tpu_layout()

    x_flat = logits.reshape(-1)
    y_flat = target.reshape(-1)

    main = (total // _LANE) * _LANE  # lane-aligned prefix length
    tail = total - main

    outs = []
    if main:
        # In the common case (total % 128 == 0) these are full-extent slices / free reshapes:
        # the inputs reach the kernel with no extra HBM passes.
        rows = main // _LANE
        x2 = x_flat[:main].reshape(rows, _LANE)
        y2 = y_flat[:main].reshape(rows, _LANE)
        blk = _choose_block_rows(rows, cap, cores)
        out2 = _run_kernel(x2, y2, out_dtype, blk)
        outs.append(out2.reshape(-1))
    if tail:
        # Ragged tail (< 128 elements): plain JAX instead of padding both inputs and re-slicing
        # the output (the old pad path cost ~2-3x extra HBM traffic for unaligned sizes).
        xt = x_flat[main:].astype(jnp.float32)
        yt = y_flat[main:].astype(jnp.float32)
        outs.append(_neg_bce_with_logits(xt, yt).astype(out_dtype))

    out = outs[0] if len(outs) == 1 else jnp.concatenate(outs)
    return out.reshape(orig_shape)


if __name__ == "__main__":
    key = jax.random.PRNGKey(0)
    k1, k2, k3, k4 = jax.random.split(key, 4)

    # Small shapes consistent with a VAE decoder output (NCHW-like), lane-aligned path.
    logits = jax.random.normal(k1, (2, 4, 16, 16), dtype=jnp.float32)
    target = (jax.random.uniform(k2, (2, 4, 16, 16)) > 0.5).astype(jnp.float32)

    out = bernoulli_log_prob(logits, target)
    out = jax.block_until_ready(out)

    ref = _neg_bce_with_logits(logits, target)
    assert out.shape == logits.shape
    assert out.dtype == logits.dtype
    assert jnp.max(jnp.abs(out - ref)) < 1e-5

    # Ragged (non-multiple-of-128) shape: exercises kernel prefix + plain-JAX tail.
    logits_r = jax.random.normal(k3, (5, 27), dtype=jnp.float32)
    target_r = (jax.random.uniform(k4, (5, 27)) > 0.5).astype(jnp.float32)
    out_r = jax.block_until_ready(bernoulli_log_prob(logits_r, target_r))
    ref_r = _neg_bce_with_logits(logits_r, target_r)
    assert out_r.shape == logits_r.shape
    assert jnp.max(jnp.abs(out_r - ref_r)) < 1e-5

    print("KERNEL_OK")
</pallas_src>

<mosaic_0001>
module attributes {stable_mosaic.version = 11 : i64} {
  func.func @_bernoulli_logprob_kernel(%arg0: i32, %arg1: memref<8x128xf32, #tpu.memory_space<vmem>>, %arg2: memref<8x128xf32, #tpu.memory_space<vmem>>, %arg3: memref<8x128xf32, #tpu.memory_space<vmem>>) attributes {dimension_semantics = [#tpu.dimension_semantics<parallel>], iteration_bounds = array<i64: 2>, scalar_prefetch = 0 : i64, scratch_operands = 0 : i64, tpu.core_type = #tpu.core_type<tc>, window_params = [{transform_indices = @transform_0, window_bounds = array<i64: 8, 128>}, {transform_indices = @transform_1, window_bounds = array<i64: 8, 128>}, {transform_indices = @transform_2, window_bounds = array<i64: 8, 128>}]} {
    %c0 = arith.constant 0 : index
    %c0_0 = arith.constant 0 : index
    %0 = vector.load %arg1[%c0, %c0_0] : memref<8x128xf32, #tpu.memory_space<vmem>>, vector<8x128xf32>
    %c0_1 = arith.constant 0 : index
    %c0_2 = arith.constant 0 : index
    %1 = vector.load %arg2[%c0_1, %c0_2] : memref<8x128xf32, #tpu.memory_space<vmem>>, vector<8x128xf32>
    %cst = arith.constant 0.000000e+00 : f32
    %2 = vector.broadcast %cst : f32 to vector<8x128xf32>
    %3 = arith.maximumf %0, %2 : vector<8x128xf32>
    %4 = arith.mulf %0, %1 : vector<8x128xf32>
    %5 = arith.subf %3, %4 : vector<8x128xf32>
    %6 = math.absf %0 : vector<8x128xf32>
    %cst_3 = arith.constant 0.000000e+00 : f32
    %7 = vector.broadcast %cst_3 : f32 to vector<8x128xf32>
    %8 = arith.subf %7, %6 : vector<8x128xf32>
    %9 = math.exp %8 : vector<8x128xf32>
    %10 = math.log1p %9 : vector<8x128xf32>
    %11 = arith.addf %5, %10 : vector<8x128xf32>
    %cst_4 = arith.constant 0.000000e+00 : f32
    %12 = vector.broadcast %cst_4 : f32 to vector<8x128xf32>
    %13 = arith.subf %12, %11 : vector<8x128xf32>
    %c0_5 = arith.constant 0 : index
    %c0_6 = arith.constant 0 : index
    %14 = vector.load %arg3[%c0_5, %c0_6] : memref<8x128xf32, #tpu.memory_space<vmem>>, vector<8x128xf32>
    tpu.vector_store %arg3[%c0_5, %c0_6], %13 {strides = array<i32>} : memref<8x128xf32, #tpu.memory_space<vmem>>, vector<8x128xf32>,
    return
  }
  func.func @transform_0(%arg0: i32) -> (i32, i32) {
    %c0_i32 = arith.constant 0 : i32
    %c0_i32_0 = arith.constant 0 : i32
    return %arg0, %c0_i32 : i32, i32
  }
  func.func @transform_1(%arg0: i32) -> (i32, i32) {
    %c0_i32 = arith.constant 0 : i32
    %c0_i32_0 = arith.constant 0 : i32
    return %arg0, %c0_i32 : i32, i32
  }
  func.func @transform_2(%arg0: i32) -> (i32, i32) {
    %c0_i32 = arith.constant 0 : i32
    %c0_i32_0 = arith.constant 0 : i32
    return %arg0, %c0_i32 : i32, i32
  }
}

</mosaic_0001>

<bundles_post_ra>
// kernel: tpu_custom_call.1
= control target key start
LH: loop header
LB: loop body
LE: loop exit
PB: predicated region body
PF: predicated region fallthrough
CT: control target
= control target key end

     0   :  { %7 = vsyncpa [#allocation3], 0  ;;  %s737_s0 = inlined_call_operand.hbm [shape: f32[16,128], index: 0, kind: input, shape index: {}]   ;;  %s738_s1 = inlined_call_operand.hbm [shape: f32[16,128], index: 1, kind: input, shape index: {}]   ;;  %s739_s2 = inlined_call_operand.hbm [shape: f32[16,128], index: 2, kind: output, shape index: {}]  }
   0x1   :  { %9 = vsyncpa [#allocation3 + $0x1], 0 }
   0x2   :  { %10 = vsyncpa [#allocation6], 0 }
   0x3   :  { %12 = vsyncpa [#allocation6 + $0x1], 0 }
   0x4   :  { %13 = vsyncpa [#allocation4], 0 }
   0x5   :  { %15 = vsyncpa [#allocation4 + $0x1], 0  ;;  %s538_s9 = smov 0   ;;  %s540_s10 = smov 0  }
   0x6   :  { %s542_s11 = smov 0   ;;  %s544_s12 = smov 0  }
   0x7 LB: > { %s559_s13 = sadd.s32 4294967295, %s518_s12   ;;  %s324_s14 = sadd.s32 4294967294, %s518_s12   ;;  %s518_s12 = sphi %s544_s12, %s758_s12   ;;  %s514_s11 = sphi %s542_s11, %s757_s11   ;;  %s510_s10 = sphi %s540_s10, %s756_s10   ;;  %s506_s9 = sphi %s538_s9, %s755_s9  }
   0x8   : > { %s563_s15 = sadd.s32 1, %s518_s12   ;;  %s28_s16 = sadd.s32 1, %s514_s11 }
   0x9   : > { %s25_s17 = ssub.s32 %s518_s12, %s563_s15  ;;  %p35_p0 = scmp.ne.s32.totalorder %s514_s11, %s510_s10 }
   0xa   : > { %p26_p1 = scmp.eq.s32.totalorder %s25_s17, 0  ;;  %p36_p2 = scmp.eq.s32.totalorder %s518_s12, 0 }
   0xb   : > { %p41_p3 = scmp.ne.s32.totalorder %s510_s10, %s506_s9  ;;  %p42_p4 = scmp.eq.s32.totalorder %s559_s13, 0 }
   0xc   : > { %s575_s18 = scalar_select %p26_p1, %s514_s11, %s28_s16  }
   0xd   : > { %p577_p5 = por %p36_p2, %p35_p0  ;;  %p581_p6 = por %p42_p4, %p41_p3 }
   0xe   : > { %p91_p7 = scmp.eq.s32.totalorder %s559_s13, 1  ;;  %p97_p8 = scmp.eq.s32.totalorder %s324_s14, 1 }
   0xf   : > { %s743_s20 = scalar_select %p581_p6, 1, 0 }
  0x10   : > { %p356_p10 = scmp.lt.s32.totalorder %s518_s12, 2  ;;  %p588_p11 = por %p91_p7, %p35_p0 }
  0x11   : > { %p592_p12 = por %p97_p8, %p41_p3  ;;  %s597_s23 = sand.u32 1, %s514_s11  }
  0x12   : > { %s744_s21 = scalar_select %p588_p11, 1, 0 }
  0x13   : > { %s745_s22 = scalar_select %p592_p12, 1, 0 }
  0x14   : > { %s328_s24 = sshll.u32 %s518_s12, 7  ;;  %s327_s25 = sshll.u32 %s597_s23, 3 }
  0x15   : > { %s606_s28 = scalar_lea.hbm %s737_s0, %s328_s24  ;;  %s121_s29 = scalar_lea.vmem [#allocation2], %s327_s25 }
  0x16   : > { %s128_s30 = sshll.u32 %s121_s29, 4  ;;  %p612_p13 = pnand %p356_p10, %p577_p5  ;;  %s616_s30 = int_to_ptr.vmem [resolvable:$true] %s128_s30 }
  0x17   : > { %s118_s4 = scalar_lea.sflag [#allocation3], %s597_s23  ;;  %s394_s5 = scalar_lea.hbm %s606_s28, 128 }
  0x18   : > { %p395_p2 = scmp.ne.s32.totalorder %s606_s28, %s394_s5  ;;  %p396_p3 = pneg %p612_p13 }
  0x19   : > { %s399_s8 = scalar_lea.hbm %s737_s0, 256  ;;  %p400_p5 = scmp.lt.s32.totalorder %s606_s28, %s737_s0 }
  0x1a   : > { %p397_p4 = pnand %p396_p3, %p395_p2  ;;  %p401_p8 = scmp.lt.s32.totalorder %s399_s8, %s394_s5 }
  0x1c   : > { %p398_p7 = pneg %p397_p4  ;;  %p402_p10 = por %p401_p8, %p400_p5 }
  0x1e   : > { %p403_p9 = pnand %p402_p10, %p398_p7 }
  0x20   : > { %406 = shalt.err (!%p403_p9)
}
  0x21   : > { %s407_s17 = scalar_lea.vmem %s616_s30, 128  ;;  %s520_s19 = smov [#allocation2]  }
  0x22   : > { %p408_p0 = scmp.ne.s32.totalorder %s616_s30, %s407_s17  ;;  %s412_s26 = sshll.u32 %s520_s19, 4  ;;  %s413_s26 = int_to_ptr.vmem [resolvable:$false] %s412_s26 }
  0x23   : > { %s414_s27 = scalar_lea.vmem %s413_s26, 256  ;;  %p415_p1 = scmp.lt.s32.totalorder %s616_s30, %s413_s26 }
  0x24   : > { %p410_p2 = pnand %p408_p0, %p396_p3  ;;  %p416_p12 = scmp.lt.s32.totalorder %s414_s27, %s407_s17 }
  0x26   : > { %p411_p4 = pneg %p410_p2  ;;  %p417_p11 = por %p416_p12, %p415_p1 }
  0x28   : > { %p418_p5 = pnand %p417_p11, %p411_p4 }
  0x2a   : > { %421 = shalt.err (!%p418_p5)
}
  0x2b   : > { %348 = dma.hbm_to_vmem [thread:$0]  (!%p612_p13), %s606_s28, 128, %s616_s30, %s118_s4  }
  0x2c   : > { %p747_p9 = scmp.lt.s32.totalorder %s518_s12, 3  ;;  %p748_p0 = scmp.ge.s32.totalorder %s518_s12, 1 }
  0x2d   : > { %s658_s7 = scalar_lea.hbm %s738_s1, %s328_s24  ;;  %s139_s8 = scalar_lea.vmem [#allocation5], %s327_s25 }
  0x2e   : > { %p649_p7 = pnand %p748_p0, %p747_p9  ;;  %s146_s14 = sshll.u32 %s139_s8, 4  ;;  %s147_s14 = int_to_ptr.vmem [resolvable:$true] %s146_s14 }
  0x2f   : > { %s136_s28 = scalar_lea.sflag [#allocation6], %s597_s23  ;;  %s422_s30 = scalar_lea.hbm %s658_s7, 128 }
  0x30   : > { %s749_s29 = scalar_select %p649_p7, 1, 0 }
  0x31   : > { %p423_p11 = scmp.ne.s32.totalorder %s658_s7, %s422_s30  ;;  %s427_s17 = scalar_lea.hbm %s738_s1, 256 }
  0x32   : > { %p428_p8 = scmp.lt.s32.totalorder %s658_s7, %s738_s1  ;;  %p429_p10 = scmp.lt.s32.totalorder %s427_s17, %s422_s30 }
  0x33   : > { %p425_p12 = pnand %p423_p11, %p396_p3 }
  0x34   : > { %p430_p2 = por %p429_p10, %p428_p8 }
  0x35   : > { %p426_p1 = pneg %p425_p12 }
  0x37   : > { %p431_p4 = pnand %p430_p2, %p426_p1 }
  0x39   : > { %434 = shalt.err (!%p431_p4)
}
  0x3a   : > { %s435_s25 = scalar_lea.vmem %s147_s14, 128  ;;  %s521_s23 = smov [#allocation5]  }
  0x3b   : > { %p436_p5 = scmp.ne.s32.totalorder %s147_s14, %s435_s25  ;;  %s440_s26 = sshll.u32 %s521_s23, 4  ;;  %s441_s26 = int_to_ptr.vmem [resolvable:$false] %s440_s26 }
  0x3c   : > { %s442_s27 = scalar_lea.vmem %s441_s26, 256  ;;  %p443_p11 = scmp.lt.s32.totalorder %s147_s14, %s441_s26 }
  0x3d   : > { %p438_p9 = pnand %p436_p5, %p396_p3  ;;  %p444_p12 = scmp.lt.s32.totalorder %s442_s27, %s435_s25 }
  0x3f   : > { %p439_p0 = pneg %p438_p9  ;;  %p445_p6 = por %p444_p12, %p443_p11 }
  0x41   : > { %p446_p7 = pnand %p445_p6, %p439_p0 }
  0x43   : > { %449 = shalt.err (!%p446_p7)
}
  0x44   : > { %351 = dma.hbm_to_vmem [thread:$0]  (!%p612_p13), %s658_s7, 128, %s147_s14, %s136_s28  }
  0x45   : > { %p750_p1 = scmp.ne.s32.totalorder %s749_s29, 0 }
  0x46   : > { %s684_s5 = sand.u32 (!%p750_p1), 1, %s510_s10   ;;  %p751_p6 = scmp.ne.s32.totalorder (!%p750_p1), %s743_s20, 0 }
  0x47   : > { %155 = sbr.rel (%p750_p1) target bundleno = 136 (0x88), region = 28  ;;  %s687_s6 = sshll.u32 (!%p750_p1), %s684_s5, 3 }
  0x48   : > { %s158_s8 = scalar_lea.sflag (!%p750_p1), [#allocation3], %s684_s5  ;;  %s161_s30 = scalar_lea.vmem (!%p750_p1), [#allocation2], %s687_s6 }
  0x4c   : > { %493 = dma.done.wait (%p751_p6), %s158_s8, 128  }
  0x4d   : > { %495 = vsyncadd (%p751_p6), %s158_s8, 4294967168  ;;  %s167_s3 = scalar_lea.sflag [#allocation6], %s684_s5  ;;  %s170_s29 = scalar_lea.vmem [#allocation5], %s687_s6 }
  0x4e   : > { %497 = dma.done.wait (%p751_p6), %s167_s3, 128  }
  0x4f   : > { %499 = vsyncadd (%p751_p6), %s167_s3, 4294967168  ;;  %v196_v0 = vld [vmem:[%s161_s30] sm:$0xff]  ;;  %v197_v7 = vld [vmem:[%s170_s29] sm:$0xff]  ;;  %s195_s20 = scalar_lea.vmem [#allocation7], %s687_s6  ;;  %s336_s14 = sshll.u32 %s559_s13, 7 }
  0x50   : > { %v201_v1 = vand.u32 2147483647, %v196_v0  ;;  %v198_v9 = vmax.f32 %v196_v0, 0.0  ;;  %v199_v10 = vmul.f32 %v197_v7, %v196_v0  ;;  %s231_s7 = sshll.u32 %s195_s20, 4  ;;  %s229_s16 = scalar_lea.hbm %s739_s2, %s336_s14  ;;  %s232_s7 = int_to_ptr.vmem [resolvable:$true] %s231_s7 }
  0x51   : > { %s218_s17 = scalar_lea.sflag [#allocation4], %s684_s5  ;;  %s450_s24 = scalar_lea.vmem %s232_s7, 128 }
  0x52   : > { %v202_v2 = vsub.f32 0.0, %v201_v1  ;;  %v200_v14 = vsub.f32 %v198_v9, %v199_v10  ;;  %p451_p13 = scmp.ne.s32.totalorder %s232_s7, %s450_s24  ;;  %p752_p3 = scmp.ne.s32.totalorder %s744_s21, 0 }
  0x53   : > { %s522_s19 = smov [#allocation7]  }
  0x54   : > { %v203_v3 = vmul.f32 1.442695, %v202_v2  ;;  %p452_p7 = pnand %p451_p13, %p752_p3  ;;  %s454_s25 = sshll.u32 %s522_s19, 4  ;;  %s455_s25 = int_to_ptr.vmem [resolvable:$false] %s454_s25 }
  0x55   : > { %s456_s23 = scalar_lea.vmem %s455_s25, 256  ;;  %p457_p10 = scmp.lt.s32.totalorder %s232_s7, %s455_s25 }
  0x56   : > { %390 = vpow2.f32 %v203_v3  ;;  %p453_p8 = pneg %p452_p7  ;;  %p458_p2 = scmp.lt.s32.totalorder %s456_s23, %s450_s24 }
  0x58   : > { %p459_p4 = por %p458_p2, %p457_p10 }
  0x5a   : > { %p460_p5 = pnand %p459_p4, %p453_p8 }
  0x63   : > { %v391_v4 = vpop.eup %390 }
  0x64   : > { %v205_v5 = vadd.f32 1.0, %v391_v4  ;;  %v208_v6 = vmul.f32 -0.5, %v391_v4  ;;  %v211_v11 = vand.u32 2147483647, %v391_v4 }
  0x66   : > { %392 = vlog2.f32 %v205_v5  ;;  %v209_v8 = vadd.f32 1.0, %v208_v6  ;;  %vm212_vm0 = vcmp.lt.f32.partialorder %v211_v11, 0.0004427343 }
  0x68   : > { %v210_v12 = vmul.f32 %v391_v4, %v209_v8 }
  0x73   : > { %v393_v13 = vpop.eup %392 }
  0x74   : > { %v207_v15 = vmul.f32 0.6931472, %v393_v13 }
  0x76   : > { %v213_v16 = vsel %vm212_vm0, %v210_v12, %v207_v15 }
  0x77   : > { %v214_v17 = vadd.f32 %v213_v16, %v200_v14 }
  0x79   : > { %v215_v18 = vsub.f32 0.0, %v214_v17 }
  0x7b   : > { %216 = vst [vmem:[%s195_s20] sm:$0xff] %v215_v18 }
  0x7c   : > { %463 = shalt.err (!%p460_p5)
}
  0x7d   : > { %s464_s13 = scalar_lea.hbm %s229_s16, 128  ;;  %s468_s5 = scalar_lea.hbm %s739_s2, 256 }
  0x7e   : > { %p465_p9 = scmp.ne.s32.totalorder %s229_s16, %s464_s13  ;;  %p469_p12 = scmp.lt.s32.totalorder %s229_s16, %s739_s2 }
  0x7f   : > { %p470_p1 = scmp.lt.s32.totalorder %s468_s5, %s464_s13 }
  0x80   : > { %p466_p0 = pnand %p465_p9, %p752_p3 }
  0x81   : > { %p471_p6 = por %p470_p1, %p469_p12 }
  0x82   : > { %p467_p11 = pneg %p466_p0 }
  0x84   : > { %p472_p13 = pnand %p471_p6, %p467_p11 }
  0x86   : > { %475 = shalt.err (!%p472_p13)
}
  0x87   : > { %343 = dma.vmem_to_hbm [thread:$0]  (%p752_p3), %s232_s7, 128, %s229_s16, %s218_s17  }
  0x88 PF: > { %s243_s30 = sand.u32 1, %s506_s9   ;;  %p753_p7 = scmp.ne.s32.totalorder %s745_s22, 0 }
  0x89   : > { %p754_p8 = scmp.ge.s32.totalorder %s518_s12, 2  ;;  %s244_s3 = scalar_lea.sflag [#allocation4], %s243_s30 }
  0x8b   : > { %p353_p10 = pnand %p754_p8, %p753_p7 }
  0x8d   : > { %p354_p2 = pneg %p353_p10 }
  0x8f   : > { %501 = dma.done.wait (%p354_p2), %s244_s3, 128  }
  0x90   : > { %503 = vsyncadd (%p354_p2), %s244_s3, 4294967168  ;;  %p18_p4 = scmp.ge.s32.totalorder %s563_s15, 4   ;;  %s755_s9 = smov %s510_s10 }
  0x91   : > { %s756_s10 = smov %s514_s11  ;;  %s757_s11 = smov %s575_s18 }
  0x92   : > { %s758_s12 = smov %s563_s15  ;;  %20 = sbr.rel (!%p18_p4) target bundleno = 7 (0x7), region = 86 }
  0x97   :  { %249 = vsyncpa [#allocation3], 1 }
  0x98   :  { %251 = vsyncpa [#allocation3 + $0x1], 1 }
  0x99   :  { %252 = vsyncpa [#allocation6], 1 }
  0x9a   :  { %254 = vsyncpa [#allocation6 + $0x1], 1 }
  0x9b   :  { %255 = vsyncpa [#allocation4], 1 }
  0x9c   :  { %257 = vsyncpa [#allocation4 + $0x1], 1 }

</bundles_post_ra>
